<compile_context>
chip_gen: v7x
topology: tpu7x:2x2x1
jax: 0.10.0
libtpu: 0.0.40
codegen_flags: <defaults>
</compile_context>

<pallas_src>
import math

import jax
import jax.numpy as jnp
from jax.experimental import pallas as pl
from jax.experimental.pallas import tpu as pltpu


DEFAULT_TILE_B = 4096


def _round_up(n, m):
    return ((n + m - 1) // m) * m


def behaviour_head_kernel(x_ref, wd_ref, bd_ref, o_ref):
    # x_ref: (TILE_B, 32), wd_ref: (32, 2), bd_ref: (1, 2), o_ref: (TILE_B, 2)
    z = jnp.dot(x_ref[...], wd_ref[...],
                preferred_element_type=jnp.float32) + bd_ref[...]   # (TILE_B, 2)
    # Exact 2-class softmax: p_c = sigmoid(l_c - l_other); columns of wd/bd
    # already hold the per-class logit differences, so this is elementwise.
    probs = 1.0 / (1.0 + jnp.exp(-z))
    o_ref[...] = probs.astype(o_ref.dtype)


def behaviour_classification_head(x, weight, bias, *, tile_b=DEFAULT_TILE_B):
    """x: (B, 32) float32; weight: (2, 32); bias: (2,). Returns (B, 2) softmax probs."""
    B, F_in = x.shape
    F_out = weight.shape[0]  # 2

    # Pre-fold the 2-class softmax: column c holds (w_c - w_other), (b_c - b_other).
    w32 = weight.astype(jnp.float32)
    b32 = bias.astype(jnp.float32)
    w_diff = jnp.stack([w32[0] - w32[1], w32[1] - w32[0]], axis=1)          # (32, 2)
    b_diff = jnp.stack([b32[0] - b32[1], b32[1] - b32[0]]).reshape(1, 2)    # (1, 2)

    # Batch tile: large for pipelining, never larger than the (8-row aligned)
    # batch itself.  Pad the ragged tail with zero rows.
    tile_b = max(8, min(tile_b, _round_up(B, 8)))
    tile_b = _round_up(tile_b, 8)
    B_pad = _round_up(B, tile_b)
    if B_pad != B:
        x = jnp.pad(x, ((0, B_pad - B), (0, 0)))

    out = pl.pallas_call(
        behaviour_head_kernel,
        out_shape=jax.ShapeDtypeStruct((B_pad, F_out), x.dtype),
        grid=(B_pad // tile_b,),
        in_specs=[
            pl.BlockSpec((tile_b, F_in), lambda i: (i, 0)),
            pl.BlockSpec((F_in, F_out), lambda i: (0, 0)),
            pl.BlockSpec((1, F_out), lambda i: (0, 0)),
        ],
        out_specs=pl.BlockSpec((tile_b, F_out), lambda i: (i, 0)),
        compiler_params=pltpu.CompilerParams(
            dimension_semantics=("parallel",),
        ),
    )(x, w_diff, b_diff)

    return out[:B] if B_pad != B else out


def init_params(key, in_features=32, out_features=2):
    """Deterministic init matching nn.Linear(32, 2) + xavier_uniform on weight."""
    kw, kb = jax.random.split(key)
    a = math.sqrt(6.0 / (in_features + out_features))  # xavier_uniform, gain=1
    weight = jax.random.uniform(
        kw, (out_features, in_features), jnp.float32, minval=-a, maxval=a
    )
    bound = 1.0 / math.sqrt(in_features)               # torch default bias init
    bias = jax.random.uniform(
        kb, (out_features,), jnp.float32, minval=-bound, maxval=bound
    )
    return weight, bias


def reference(x, weight, bias):
    logits = x @ weight.T + bias
    return jax.nn.softmax(logits, axis=1)


if __name__ == "__main__":
    key = jax.random.PRNGKey(0)
    k_x, k_p, k_x2 = jax.random.split(key, 3)

    F_in, F_out = 32, 2
    weight, bias = init_params(k_p, F_in, F_out)

    # Small case (matches the module's tiny-head usage).
    B = 8
    x = jax.random.normal(k_x, (B, F_in), jnp.float32)
    out = behaviour_classification_head(x, weight, bias)
    out = jax.block_until_ready(out)
    ref = reference(x, weight, bias)
    assert out.shape == (B, F_out)
    assert jnp.allclose(out, ref, atol=1e-5, rtol=1e-5), "mismatch vs reference (B=8)"
    assert jnp.allclose(jnp.sum(out, axis=1), 1.0, atol=1e-5), "rows must sum to 1"

    # Larger ragged case exercising batch tiling + tail padding.
    B2 = 1000
    x2 = jax.random.normal(k_x2, (B2, F_in), jnp.float32)
    out2 = behaviour_classification_head(x2, weight, bias, tile_b=256)
    out2 = jax.block_until_ready(out2)
    ref2 = reference(x2, weight, bias)
    assert out2.shape == (B2, F_out)
    assert jnp.allclose(out2, ref2, atol=1e-5, rtol=1e-5), "mismatch vs reference (B=1000)"
    assert jnp.allclose(jnp.sum(out2, axis=1), 1.0, atol=1e-5), "rows must sum to 1"

    print("KERNEL_OK")
</pallas_src>

<mosaic_0001>
module attributes {stable_mosaic.version = 11 : i64} {
  func.func @behaviour_head_kernel(%arg0: i32, %arg1: memref<8x32xf32, #tpu.memory_space<vmem>>, %arg2: memref<32x2xf32, #tpu.memory_space<vmem>>, %arg3: memref<1x2xf32, #tpu.memory_space<vmem>>, %arg4: memref<8x2xf32, #tpu.memory_space<vmem>>) attributes {dimension_semantics = [#tpu.dimension_semantics<parallel>], iteration_bounds = array<i64: 1>, scalar_prefetch = 0 : i64, scratch_operands = 0 : i64, tpu.core_type = #tpu.core_type<tc>, window_params = [{transform_indices = @transform_0, window_bounds = array<i64: 8, 32>}, {pipeline_mode = #tpu.pipeline_mode<synchronous>, transform_indices = @transform_1, window_bounds = array<i64: 32, 2>}, {pipeline_mode = #tpu.pipeline_mode<synchronous>, transform_indices = @transform_2, window_bounds = array<i64: 1, 2>}, {transform_indices = @transform_3, window_bounds = array<i64: 8, 2>}]} {
    %c0 = arith.constant 0 : index
    %c0_0 = arith.constant 0 : index
    %0 = vector.load %arg1[%c0, %c0_0] : memref<8x32xf32, #tpu.memory_space<vmem>>, vector<8x32xf32>
    %c0_1 = arith.constant 0 : index
    %c0_2 = arith.constant 0 : index
    %1 = vector.load %arg2[%c0_1, %c0_2] : memref<32x2xf32, #tpu.memory_space<vmem>>, vector<32x2xf32>
    %cst = arith.constant dense<0.000000e+00> : vector<8x2xf32>
    %2 = tpu.matmul %0, %1, %cst {dimension_numbers = #tpu.dot_dimension_numbers<[1], [0], [0], [1], [0, 0, 1, 1], [], []>} : vector<8x32xf32>, vector<32x2xf32>, vector<8x2xf32> -> vector<8x2xf32>
    %c0_3 = arith.constant 0 : index
    %c0_4 = arith.constant 0 : index
    %3 = vector.load %arg3[%c0_3, %c0_4] : memref<1x2xf32, #tpu.memory_space<vmem>>, vector<1x2xf32>
    %4 = vector.broadcast %3 : vector<1x2xf32> to vector<8x2xf32>
    %5 = arith.addf %2, %4 : vector<8x2xf32>
    %cst_5 = arith.constant 0.000000e+00 : f32
    %6 = vector.broadcast %cst_5 : f32 to vector<8x2xf32>
    %7 = arith.subf %6, %5 : vector<8x2xf32>
    %8 = math.exp %7 : vector<8x2xf32>
    %cst_6 = arith.constant 1.000000e+00 : f32
    %9 = vector.broadcast %cst_6 : f32 to vector<8x2xf32>
    %10 = arith.addf %9, %8 : vector<8x2xf32>
    %cst_7 = arith.constant 1.000000e+00 : f32
    %11 = vector.broadcast %cst_7 : f32 to vector<8x2xf32>
    %12 = arith.divf %11, %10 : vector<8x2xf32>
    %c0_8 = arith.constant 0 : index
    %c0_9 = arith.constant 0 : index
    %13 = vector.load %arg4[%c0_8, %c0_9] : memref<8x2xf32, #tpu.memory_space<vmem>>, vector<8x2xf32>
    tpu.vector_store %arg4[%c0_8, %c0_9], %12 {strides = array<i32>} : memref<8x2xf32, #tpu.memory_space<vmem>>, vector<8x2xf32>,
    return
  }
  func.func @transform_0(%arg0: i32) -> (i32, i32) {
    %c0_i32 = arith.constant 0 : i32
    %c0_i32_0 = arith.constant 0 : i32
    return %arg0, %c0_i32 : i32, i32
  }
  func.func @transform_1(%arg0: i32) -> (i32, i32) {
    %c0_i32 = arith.constant 0 : i32
    %c0_i32_0 = arith.constant 0 : i32
    %c0_i32_1 = arith.constant 0 : i32
    return %c0_i32, %c0_i32_0 : i32, i32
  }
  func.func @transform_2(%arg0: i32) -> (i32, i32) {
    %c0_i32 = arith.constant 0 : i32
    %c0_i32_0 = arith.constant 0 : i32
    %c0_i32_1 = arith.constant 0 : i32
    return %c0_i32, %c0_i32_0 : i32, i32
  }
  func.func @transform_3(%arg0: i32) -> (i32, i32) {
    %c0_i32 = arith.constant 0 : i32
    %c0_i32_0 = arith.constant 0 : i32
    return %arg0, %c0_i32 : i32, i32
  }
}

</mosaic_0001>

<bundles_post_ra>
// kernel: tpu_custom_call.1
= control target key start
LH: loop header
LB: loop body
LE: loop exit
PB: predicated region body
PF: predicated region fallthrough
CT: control target
= control target key end

     0   :  { %v143_v0 = vmov 0.0|0.0   ;;  %vm144_vm0 = vmmov 0   ;;  %v145_v4 = vmov 0.0   ;;  %vm26_vm1 = vcmask 261120   ;;  %s187_s1 = inlined_call_operand.vmem [shape: f32[32,2], index: 1, kind: input, shape index: {}]   ;;  %s188_s0 = inlined_call_operand.vmem [shape: f32[8,32], index: 0, kind: input, shape index: {}]   ;;  %s189_s2 = inlined_call_operand.vmem [shape: f32[1,2], index: 2, kind: input, shape index: {}]   ;;  %s190_s3 = inlined_call_operand.vmem [shape: f32[8,2], index: 3, kind: output, shape index: {}]  }
   0x1   :  { %130 = vmatprep.subr.bf16.mxu0 %v143_v0  ;;  %v15_v1 = vld [vmem:[%s187_s1] sm:$0xff]  ;;  %v16_v2 = vld [vmem:[%s187_s1 + $0x8] sm:$0xff]  ;;  %v17_v3 = vld [vmem:[%s187_s1 + $0x10] sm:$0xff]  ;;  %127 = vmatprep.mubr.msk.f32.mxu0 %vm144_vm0, %v145_v4  ;;  %vm106_vm2 = vcmask 15360  }
   0x2   :  { %v131_v5 = vpack.c.bf16 %v16_v2, %v15_v1  ;;  %v18_v6 = vld [vmem:[%s187_s1 + $0x18] sm:$0xff]  ;;  %v14_v8 = vld [vmem:[%s188_s0] sm:$0xff] }
   0x3   :  { %v134_v7 = vpack.c.bf16 %v18_v6, %v17_v3  ;;  %v112_v9 = vld [vmem:[%s189_s2] ss:$0 sm:$0xff] }
   0x4   :  { %132 = vmatpush3.bf16.msra.mxu0 %v131_v5 }
   0x5   :  { %133 = vmatprep.subr.bf16.mxu0 %v143_v0 }
   0x8   :  { %135 = vmatpush3.bf16.msra.mxu0 %v134_v7 }
   0xb   :  { %128 = vmatmul.mubr.msk.f32.vlgmr.msra.gmra.mrb[0].mxu0 %vm26_vm1, %v14_v8 }
  0xde   :  { %v96_v10 = vpop.f32.mrb[0].mxu0 }
  0xdf   :  { %v97_v11 = vadd.f32 %v112_v9, %v96_v10  ;;  %v129_v12 = vpop.f32.mrb[1].mxu0 }
  0xe1   :  { %v100_v13 = vsub.f32 0.0, %v97_v11 }
  0xe3   :  { %v101_v14 = vmul.f32 1.442695, %v100_v13 }
  0xe5   :  { %139 = vpow2.f32 %v101_v14 }
  0xef   :  { %v140_v15 = vpop.eup %139 }
  0xf0   :  { %v103_v16 = vadd.f32 1.0, %v140_v15 }
  0xf2   :  { %141 = vrcp.f32 %v103_v16 }
  0xfc   :  { %v142_v17 = vpop.eup %141 }
  0xfd   :  { %107 = vst.msk [vmem:[%s190_s3] sm:$0xff] %vm106_vm2, %v142_v17 }

</bundles_post_ra>
